<compile_context>
chip_gen: v5e
topology: v5e:2x2
jax: 0.10.0
libtpu: 0.0.40
codegen_flags: <defaults>
</compile_context>

<pallas_src>
import jax
import jax.numpy as jnp
from jax.experimental import pallas as pl
from jax.experimental.pallas import tpu as pltpu

EPS = 1e-12        # torch.nn.functional.normalize default eps
LANES = 128        # lane-dense hidden width (layer dims zero-padded to 128)
IN_LANES = 8       # narrow input slab width (state is 4-d, padded to 8)
OUT_LANES = 8      # narrow output slab width (3 meaningful lanes, padded to 8)
MAX_TILE = 512     # batch rows per grid step (512 ~= 85% of HBM roofline per tile sweeps)


def _round_up(n, m):
    return ((n + m - 1) // m) * m


def _choose_tile(batch):
    """Pick the batch tile: big tiles amortize the ~0.35us/step overhead; >=2 grid
    steps whenever possible so the 'parallel' axis feeds both v7x TensorCores."""
    b8 = _round_up(batch, 8)
    if b8 < 16:
        return b8                          # tiny batch: single tile
    if b8 >= 2 * MAX_TILE:
        return MAX_TILE                    # large batch: 512-row tiles, grid >= 2
    return _round_up(-(-b8 // 2), 8)       # medium batch: split in two tiles


def actor_critic_kernel(x_ref, w0_ref, w_ref, b_ref, out_ref):
    # x_ref: (TILE, 8) f32; lanes 0:4 hold the state, remaining lanes are zero.
    x = x_ref[...]

    # ---- F.normalize(x, dim=0): x / max(||x||_2, eps) per state (row) ----
    sq = jnp.sum(x * x, axis=-1, keepdims=True)             # zero pad lanes contribute 0
    xn = x * jax.lax.rsqrt(jnp.maximum(sq, EPS * EPS))       # == x / max(sqrt(sq), eps)

    # Actor-lane mask, built once from a (1, 128) iota and broadcast where needed.
    lane = jax.lax.broadcasted_iota(jnp.int32, (1, LANES), 1)
    amask = lane < 2

    # ---- shared trunk: 4 -> 25 -> 50 (zero-padded to 128 lanes; pad lanes stay 0) ----
    y = jnp.dot(xn.astype(jnp.bfloat16), w0_ref[...],
                preferred_element_type=jnp.float32) + b_ref[0:1, :]
    y = jnp.maximum(y, 0.0)                                  # (TILE, 128), cols 25: == 0
    y = jnp.dot(y.astype(jnp.bfloat16), w_ref[0],
                preferred_element_type=jnp.float32) + b_ref[1:2, :]
    y = jnp.maximum(y, 0.0)                                  # (TILE, 128), cols 50: == 0

    # ---- fused heads: one matmul; lanes 0:2 = actor logits, lanes 2:27 = critic hidden ----
    h = jnp.dot(y.astype(jnp.bfloat16), w_ref[1],
                preferred_element_type=jnp.float32) + b_ref[2:3, :]

    # actor: log_softmax over the 2 logit lanes (masked reductions, no sub-lane slices).
    m = jnp.max(jnp.where(amask, h, -jnp.inf), axis=-1, keepdims=True)
    z = h - m
    denom = jnp.sum(jnp.where(amask, jnp.exp(z), 0.0), axis=-1, keepdims=True)
    log_probs = z - jnp.log(denom)                           # valid on lanes 0:2

    # critic: relu(h) @ Wc. Wc rows 0:2 and 27: are zero, so the actor-logit lanes and the
    # zero pad lanes contribute nothing; the critic weight column is placed at lane 2.
    c = jnp.maximum(h, 0.0)
    v = jnp.tanh(jnp.dot(c.astype(jnp.bfloat16), w_ref[2],
                         preferred_element_type=jnp.float32) + b_ref[3:4, :])

    # lanes 0:2 = actor log-probs, lane 2 = critic value; store only the first 8 lanes.
    out_ref[...] = jnp.where(amask, log_probs, v)[:, :OUT_LANES]


def init_params(key):
    """torch.nn.Linear default init: U(-k, k), k = 1/sqrt(fan_in). Natural shapes:
    weights (in_features, out_features), biases (out_features,)."""
    dims = [(4, 25), (25, 50), (50, 2), (50, 25), (25, 1)]
    keys = jax.random.split(key, 2 * len(dims))
    params = []
    for i, (fan_in, fan_out) in enumerate(dims):
        k = 1.0 / jnp.sqrt(jnp.float32(fan_in))
        w = jax.random.uniform(keys[2 * i], (fan_in, fan_out), jnp.float32, -k, k)
        b = jax.random.uniform(keys[2 * i + 1], (fan_out,), jnp.float32, -k, k)
        params += [w, b]
    return tuple(params)  # (w1,b1,w2,b2,wa,ba,w3,b3,wc,bc)


def pack_params(params):
    """Pack the 5 Linear layers into three resident slabs:
       W0 (8, 128)       bf16 : l1 (rows 0:4)
       W  (3, 128, 128)  bf16 : l2 | fused [actor_l1 @ lanes 0:2, l3 @ lanes 2:27] | critic_l1
       B  (8, 128)       f32  : per-layer bias rows (biases stay f32; added to f32 accs).
    """
    w1, b1, w2, b2, wa, ba, w3, b3, wc, bc = params
    W0 = jnp.zeros((IN_LANES, LANES), jnp.float32).at[:4, :25].set(w1)
    W = jnp.zeros((3, LANES, LANES), jnp.float32)
    W = W.at[0, :25, :50].set(w2)                # l2
    W = W.at[1, :50, 0:2].set(wa)                # actor_l1 (lanes 0:2)
    W = W.at[1, :50, 2:27].set(w3)               # l3       (lanes 2:27)  -- fused head
    W = W.at[2, 2:27, 2:3].set(wc)               # critic_l1, output mapped to lane 2
    Bv = jnp.zeros((8, LANES), jnp.float32)
    Bv = Bv.at[0, :25].set(b1)
    Bv = Bv.at[1, :50].set(b2)
    Bv = Bv.at[2, 0:2].set(ba)
    Bv = Bv.at[2, 2:27].set(b3)
    Bv = Bv.at[3, 2].set(bc[0])
    return W0.astype(jnp.bfloat16), W.astype(jnp.bfloat16), Bv


@jax.jit
def _forward_batched(x, w0_slab, w_slab, b_slab):
    """x: (B, 4) f32. Returns (actor_logprobs (B, 2), critic_value (B, 1))."""
    B = x.shape[0]
    tile = _choose_tile(B)
    B_pad = _round_up(B, tile)
    # Narrow (B_pad, 8) input slab: lanes 0:4 = state, rest zero. Padded rows are zero;
    # they normalize to zero and produce ignored outputs.
    x_pad = jnp.zeros((B_pad, IN_LANES), jnp.float32).at[:B, :4].set(x)
    out = pl.pallas_call(
        actor_critic_kernel,
        out_shape=jax.ShapeDtypeStruct((B_pad, OUT_LANES), jnp.float32),
        grid=(B_pad // tile,),
        in_specs=[
            pl.BlockSpec((tile, IN_LANES), lambda i: (i, 0)),        # states (narrow)
            pl.BlockSpec((IN_LANES, LANES), lambda i: (0, 0)),       # l1 weights (resident)
            pl.BlockSpec((3, LANES, LANES), lambda i: (0, 0, 0)),    # weight slab (resident)
            pl.BlockSpec((8, LANES), lambda i: (0, 0)),              # bias slab (resident)
        ],
        out_specs=pl.BlockSpec((tile, OUT_LANES), lambda i: (i, 0)),
        compiler_params=pltpu.CompilerParams(
            dimension_semantics=("parallel",)),                      # megacore split on v7x
    )(x_pad, w0_slab, w_slab, b_slab)
    return out[:B, 0:2], out[:B, 2:3]


def actor_critic_forward(x, w0_slab, w_slab, b_slab):
    """Accepts a single (4,) state (original PyTorch usage) or a (B, 4) batch."""
    x = jnp.asarray(x, jnp.float32)
    single = x.ndim == 1
    if single:
        x = x[None, :]
    actor, critic = _forward_batched(x, w0_slab, w_slab, b_slab)
    if single:
        return actor[0], critic[0]
    return actor, critic


def reference_forward(x, params):
    """Plain-JAX f32 reference mirroring the PyTorch forward, applied per state (row)."""
    w1, b1, w2, b2, wa, ba, w3, b3, wc, bc = params
    norm = jnp.sqrt(jnp.sum(x * x, axis=-1, keepdims=True))
    xn = x / jnp.maximum(norm, EPS)
    y = jax.nn.relu(xn @ w1 + b1)
    y = jax.nn.relu(y @ w2 + b2)
    actor = jax.nn.log_softmax(y @ wa + ba, axis=-1)
    c = jax.nn.relu(y @ w3 + b3)
    critic = jnp.tanh(c @ wc + bc)
    return actor, critic


if __name__ == "__main__":
    key = jax.random.PRNGKey(0)
    pkey, xkey, x2key = jax.random.split(key, 3)
    params = init_params(pkey)
    w0_slab, w_slab, b_slab = pack_params(params)

    # bf16 MXU operands vs f32 reference => loosened tolerances (per review).
    ATOL = 5e-2
    RTOL = 5e-2

    # Small batch of CartPole-like states (rollout steps x workers flattened).
    B = 8
    x = jax.random.normal(xkey, (B, 4), jnp.float32)
    actor, critic = actor_critic_forward(x, w0_slab, w_slab, b_slab)
    jax.block_until_ready((actor, critic))
    ref_actor, ref_critic = reference_forward(x, params)
    assert actor.shape == (B, 2) and critic.shape == (B, 1)
    assert jnp.allclose(actor, ref_actor, atol=ATOL, rtol=RTOL)
    assert jnp.allclose(critic, ref_critic, atol=ATOL, rtol=RTOL)

    # Single-state path (exactly the original module's calling convention).
    a1, c1 = actor_critic_forward(x[0], w0_slab, w_slab, b_slab)
    jax.block_until_ready((a1, c1))
    assert a1.shape == (2,) and c1.shape == (1,)
    assert jnp.allclose(a1, ref_actor[0], atol=ATOL, rtol=RTOL)
    assert jnp.allclose(c1, ref_critic[0], atol=ATOL, rtol=RTOL)

    # Multi-tile path (>= 2 grid steps, padded batch rows) to exercise the pipeline.
    B2 = 600
    x2 = jax.random.normal(x2key, (B2, 4), jnp.float32)
    actor2, critic2 = actor_critic_forward(x2, w0_slab, w_slab, b_slab)
    jax.block_until_ready((actor2, critic2))
    ref_actor2, ref_critic2 = reference_forward(x2, params)
    assert actor2.shape == (B2, 2) and critic2.shape == (B2, 1)
    assert jnp.allclose(actor2, ref_actor2, atol=ATOL, rtol=RTOL)
    assert jnp.allclose(critic2, ref_critic2, atol=ATOL, rtol=RTOL)

    print("KERNEL_OK")
</pallas_src>

<mosaic_0001>
module attributes {stable_mosaic.version = 11 : i64} {
  func.func @actor_critic_kernel(%arg0: i32, %arg1: memref<8x8xf32, #tpu.memory_space<vmem>>, %arg2: memref<8x128xbf16, #tpu.memory_space<vmem>>, %arg3: memref<3x128x128xbf16, #tpu.memory_space<vmem>>, %arg4: memref<8x128xf32, #tpu.memory_space<vmem>>, %arg5: memref<8x8xf32, #tpu.memory_space<vmem>>) attributes {dimension_semantics = [#tpu.dimension_semantics<parallel>], iteration_bounds = array<i64: 1>, scalar_prefetch = 0 : i64, scratch_operands = 0 : i64, tpu.core_type = #tpu.core_type<tc>, window_params = [{transform_indices = @transform_0, window_bounds = array<i64: 8, 8>}, {pipeline_mode = #tpu.pipeline_mode<synchronous>, transform_indices = @transform_1, window_bounds = array<i64: 8, 128>}, {pipeline_mode = #tpu.pipeline_mode<synchronous>, transform_indices = @transform_2, window_bounds = array<i64: 3, 128, 128>}, {pipeline_mode = #tpu.pipeline_mode<synchronous>, transform_indices = @transform_3, window_bounds = array<i64: 8, 128>}, {transform_indices = @transform_4, window_bounds = array<i64: 8, 8>}]} {
    %c0 = arith.constant 0 : index
    %c0_0 = arith.constant 0 : index
    %0 = vector.load %arg1[%c0, %c0_0] : memref<8x8xf32, #tpu.memory_space<vmem>>, vector<8x8xf32>
    %1 = arith.mulf %0, %0 : vector<8x8xf32>
    %cst = arith.constant dense<0.000000e+00> : vector<8xf32>
    %2 = vector.multi_reduction <add>, %1, %cst [1] : vector<8x8xf32> to vector<8xf32>
    %3 = vector.shape_cast %2 : vector<8xf32> to vector<8x1xf32>
    %cst_1 = arith.constant 1.000000e-24 : f32
    %4 = vector.broadcast %cst_1 : f32 to vector<8x1xf32>
    %5 = arith.maximumf %3, %4 : vector<8x1xf32>
    %6 = math.rsqrt %5 : vector<8x1xf32>
    %7 = vector.broadcast %6 : vector<8x1xf32> to vector<8x8xf32>
    %8 = arith.mulf %0, %7 : vector<8x8xf32>
    %9 = tpu.iota {dimensions = array<i32: 1>} : vector<1x128xi32>
    %c2_i32 = arith.constant 2 : i32
    %10 = vector.broadcast %c2_i32 : i32 to vector<1x128xi32>
    %11 = arith.cmpi slt, %9, %10 : vector<1x128xi32>
    %12 = arith.truncf %8 : vector<8x8xf32> to vector<8x8xbf16>
    %c0_2 = arith.constant 0 : index
    %c0_3 = arith.constant 0 : index
    %13 = vector.load %arg2[%c0_2, %c0_3] : memref<8x128xbf16, #tpu.memory_space<vmem>>, vector<8x128xbf16>
    %cst_4 = arith.constant dense<0.000000e+00> : vector<8x128xf32>
    %14 = tpu.matmul %12, %13, %cst_4 {dimension_numbers = #tpu.dot_dimension_numbers<[1], [0], [0], [1], [0, 0, 1, 1], [], []>} : vector<8x8xbf16>, vector<8x128xbf16>, vector<8x128xf32> -> vector<8x128xf32>
    %c0_5 = arith.constant 0 : index
    %c0_6 = arith.constant 0 : index
    %15 = vector.load %arg4[%c0_5, %c0_6] : memref<8x128xf32, #tpu.memory_space<vmem>>, vector<1x128xf32>
    %16 = vector.broadcast %15 : vector<1x128xf32> to vector<8x128xf32>
    %17 = arith.addf %14, %16 : vector<8x128xf32>
    %cst_7 = arith.constant 0.000000e+00 : f32
    %18 = vector.broadcast %cst_7 : f32 to vector<8x128xf32>
    %19 = arith.maximumf %17, %18 : vector<8x128xf32>
    %20 = arith.truncf %19 : vector<8x128xf32> to vector<8x128xbf16>
    %c0_8 = arith.constant 0 : index
    %c0_9 = arith.constant 0 : index
    %c0_10 = arith.constant 0 : index
    %21 = vector.load %arg3[%c0_8, %c0_9, %c0_10] : memref<3x128x128xbf16, #tpu.memory_space<vmem>>, vector<1x128x128xbf16>
    %22 = vector.shape_cast %21 : vector<1x128x128xbf16> to vector<128x128xbf16>
    %cst_11 = arith.constant dense<0.000000e+00> : vector<8x128xf32>
    %23 = tpu.matmul %20, %22, %cst_11 {dimension_numbers = #tpu.dot_dimension_numbers<[1], [0], [0], [1], [0, 0, 1, 1], [], []>} : vector<8x128xbf16>, vector<128x128xbf16>, vector<8x128xf32> -> vector<8x128xf32>
    %c1 = arith.constant 1 : index
    %c0_12 = arith.constant 0 : index
    %24 = vector.load %arg4[%c1, %c0_12] : memref<8x128xf32, #tpu.memory_space<vmem>>, vector<1x128xf32>
    %25 = vector.broadcast %24 : vector<1x128xf32> to vector<8x128xf32>
    %26 = arith.addf %23, %25 : vector<8x128xf32>
    %cst_13 = arith.constant 0.000000e+00 : f32
    %27 = vector.broadcast %cst_13 : f32 to vector<8x128xf32>
    %28 = arith.maximumf %26, %27 : vector<8x128xf32>
    %29 = arith.truncf %28 : vector<8x128xf32> to vector<8x128xbf16>
    %c1_14 = arith.constant 1 : index
    %c0_15 = arith.constant 0 : index
    %c0_16 = arith.constant 0 : index
    %30 = vector.load %arg3[%c1_14, %c0_15, %c0_16] : memref<3x128x128xbf16, #tpu.memory_space<vmem>>, vector<1x128x128xbf16>
    %31 = vector.shape_cast %30 : vector<1x128x128xbf16> to vector<128x128xbf16>
    %cst_17 = arith.constant dense<0.000000e+00> : vector<8x128xf32>
    %32 = tpu.matmul %29, %31, %cst_17 {dimension_numbers = #tpu.dot_dimension_numbers<[1], [0], [0], [1], [0, 0, 1, 1], [], []>} : vector<8x128xbf16>, vector<128x128xbf16>, vector<8x128xf32> -> vector<8x128xf32>
    %c2 = arith.constant 2 : index
    %c0_18 = arith.constant 0 : index
    %33 = vector.load %arg4[%c2, %c0_18] : memref<8x128xf32, #tpu.memory_space<vmem>>, vector<1x128xf32>
    %34 = vector.broadcast %33 : vector<1x128xf32> to vector<8x128xf32>
    %35 = arith.addf %32, %34 : vector<8x128xf32>
    %cst_19 = arith.constant 0xFF800000 : f32
    %36 = vector.shape_cast %11 : vector<1x128xi1> to vector<1x128xi1>
    %37 = vector.broadcast %36 : vector<1x128xi1> to vector<8x128xi1>
    %38 = vector.broadcast %cst_19 : f32 to vector<8x128xf32>
    %39 = arith.select %37, %35, %38 : vector<8x128xi1>, vector<8x128xf32>
    %cst_20 = arith.constant dense<0xFF800000> : vector<8xf32>
    %40 = vector.multi_reduction <maximumf>, %39, %cst_20 [1] : vector<8x128xf32> to vector<8xf32>
    %41 = vector.shape_cast %40 : vector<8xf32> to vector<8x1xf32>
    %42 = vector.broadcast %41 : vector<8x1xf32> to vector<8x128xf32>
    %43 = arith.subf %35, %42 : vector<8x128xf32>
    %44 = math.exp %43 : vector<8x128xf32>
    %cst_21 = arith.constant 0.000000e+00 : f32
    %45 = vector.shape_cast %11 : vector<1x128xi1> to vector<1x128xi1>
    %46 = vector.broadcast %45 : vector<1x128xi1> to vector<8x128xi1>
    %47 = vector.broadcast %cst_21 : f32 to vector<8x128xf32>
    %48 = arith.select %46, %44, %47 : vector<8x128xi1>, vector<8x128xf32>
    %cst_22 = arith.constant dense<0.000000e+00> : vector<8xf32>
    %49 = vector.multi_reduction <add>, %48, %cst_22 [1] : vector<8x128xf32> to vector<8xf32>
    %50 = vector.shape_cast %49 : vector<8xf32> to vector<8x1xf32>
    %51 = math.log %50 : vector<8x1xf32>
    %52 = vector.broadcast %51 : vector<8x1xf32> to vector<8x128xf32>
    %53 = arith.subf %43, %52 : vector<8x128xf32>
    %cst_23 = arith.constant 0.000000e+00 : f32
    %54 = vector.broadcast %cst_23 : f32 to vector<8x128xf32>
    %55 = arith.maximumf %35, %54 : vector<8x128xf32>
    %56 = arith.truncf %55 : vector<8x128xf32> to vector<8x128xbf16>
    %c2_24 = arith.constant 2 : index
    %c0_25 = arith.constant 0 : index
    %c0_26 = arith.constant 0 : index
    %57 = vector.load %arg3[%c2_24, %c0_25, %c0_26] : memref<3x128x128xbf16, #tpu.memory_space<vmem>>, vector<1x128x128xbf16>
    %58 = vector.shape_cast %57 : vector<1x128x128xbf16> to vector<128x128xbf16>
    %cst_27 = arith.constant dense<0.000000e+00> : vector<8x128xf32>
    %59 = tpu.matmul %56, %58, %cst_27 {dimension_numbers = #tpu.dot_dimension_numbers<[1], [0], [0], [1], [0, 0, 1, 1], [], []>} : vector<8x128xbf16>, vector<128x128xbf16>, vector<8x128xf32> -> vector<8x128xf32>
    %c3 = arith.constant 3 : index
    %c0_28 = arith.constant 0 : index
    %60 = vector.load %arg4[%c3, %c0_28] : memref<8x128xf32, #tpu.memory_space<vmem>>, vector<1x128xf32>
    %61 = vector.broadcast %60 : vector<1x128xf32> to vector<8x128xf32>
    %62 = arith.addf %59, %61 : vector<8x128xf32>
    %63 = math.tanh %62 : vector<8x128xf32>
    %64 = vector.shape_cast %11 : vector<1x128xi1> to vector<1x128xi1>
    %65 = vector.broadcast %64 : vector<1x128xi1> to vector<8x128xi1>
    %66 = arith.select %65, %53, %63 : vector<8x128xi1>, vector<8x128xf32>
    %67 = vector.extract_strided_slice %66 {offsets = [0, 0], sizes = [8, 8], strides = [1, 1]} : vector<8x128xf32> to vector<8x8xf32>
    %c0_29 = arith.constant 0 : index
    %c0_30 = arith.constant 0 : index
    %68 = vector.load %arg5[%c0_29, %c0_30] : memref<8x8xf32, #tpu.memory_space<vmem>>, vector<8x8xf32>
    tpu.vector_store %arg5[%c0_29, %c0_30], %67 {strides = array<i32>} : memref<8x8xf32, #tpu.memory_space<vmem>>, vector<8x8xf32>,
    return
  }
  func.func @transform_0(%arg0: i32) -> (i32, i32) {
    %c0_i32 = arith.constant 0 : i32
    %c0_i32_0 = arith.constant 0 : i32
    return %arg0, %c0_i32 : i32, i32
  }
  func.func @transform_1(%arg0: i32) -> (i32, i32) {
    %c0_i32 = arith.constant 0 : i32
    %c0_i32_0 = arith.constant 0 : i32
    %c0_i32_1 = arith.constant 0 : i32
    return %c0_i32, %c0_i32_0 : i32, i32
  }
  func.func @transform_2(%arg0: i32) -> (i32, i32, i32) {
    %c0_i32 = arith.constant 0 : i32
    %c0_i32_0 = arith.constant 0 : i32
    %c0_i32_1 = arith.constant 0 : i32
    %c0_i32_2 = arith.constant 0 : i32
    return %c0_i32, %c0_i32_0, %c0_i32_1 : i32, i32, i32
  }
  func.func @transform_3(%arg0: i32) -> (i32, i32) {
    %c0_i32 = arith.constant 0 : i32
    %c0_i32_0 = arith.constant 0 : i32
    %c0_i32_1 = arith.constant 0 : i32
    return %c0_i32, %c0_i32_0 : i32, i32
  }
  func.func @transform_4(%arg0: i32) -> (i32, i32) {
    %c0_i32 = arith.constant 0 : i32
    %c0_i32_0 = arith.constant 0 : i32
    return %arg0, %c0_i32 : i32, i32
  }
}

</mosaic_0001>

<bundles_post_ra>
// kernel: _forward_batched.1
= control target key start
LH: loop header
LB: loop body
LE: loop exit
PB: predicated region body
PF: predicated region fallthrough
CT: control target
= control target key end

     0   :  { %9 = vsyncpa [#allocation3], 0  ;;  %s508_s18 = smov [#allocation2]   ;;  %s509_s20 = smov 64   ;;  %s566_s0 = inlined_call_operand.vmem [shape: f32[8,8], index: 0, kind: input, shape index: {}]   ;;  %s567_s1 = inlined_call_operand.vmem [shape: bf16[8,128], index: 1, kind: input, shape index: {}]   ;;  %s568_s2 = inlined_call_operand.hbm [shape: bf16[3,128,128], index: 2, kind: input, shape index: {}]   ;;  %s569_s3 = inlined_call_operand.vmem [shape: f32[8,128], index: 3, kind: input, shape index: {}]   ;;  %s570_s4 = inlined_call_operand.vmem [shape: f32[8,8], index: 4, kind: output, shape index: {}]  }
   0x1   :  { %s18_s17 = sshll.u32 %s568_s2, 4  ;;  %s20_s19 = sshll.u32 %s508_s18, 4  ;;  %s19_s17 = int_to_ptr.hbm [resolvable:$true] %s18_s17  ;;  %s21_s19 = int_to_ptr.vmem [resolvable:$true] %s20_s19 }
   0x2   :  { %s510_s21 = smov 4  }
   0x3   :  { %26 = dma.hbm_to_vmem [thread:$0]  %s19_s17, 3072, %s21_s19, [#allocation3], %s509_s20, %s509_s20, %s510_s21  }
   0x4   :  { %506 = dma.done.wait [#allocation3], 3072  }
   0x5   :  { %507 = vsyncadd [#allocation3], 4294964224  ;;  %v34_v0 = vld [vmem:[%s566_s0] sm:$0xff]  ;;  %vm36_vm0 = vcmask 64512   ;;  %vm62_vm1 = vcmask 1043456   ;;  %v450_v5 = vld [vmem:[#allocation2 + $0x38] sm:$0xff]  ;;  %v52_v52 = vlaneseq }
   0x6   :  { %v35_v1 = vmul.f32 %v34_v0, %v34_v0  ;;  %v56_v3 = vld [vmem:[%s567_s1] sm:$0xf]  ;;  %147 = vmatpush.bf16.msra.mxu1 %v450_v5  ;;  %v449_v6 = vld [vmem:[#allocation2 + $0x30] sm:$0xff]  ;;  %v448_v7 = vld [vmem:[#allocation2 + $0x28] sm:$0xff] }
   0x7   :  { %v64_v4 = vsel %vm62_vm1, %v56_v3, 0  ;;  %v447_v10 = vld [vmem:[#allocation2 + $0x20] sm:$0xff]  ;;  %v446_v11 = vld [vmem:[#allocation2 + $0x18] sm:$0xff]  ;;  %v445_v14 = vld [vmem:[#allocation2 + $0x10] sm:$0xff]  ;;  %v53_v53 = vand.u32 127, %v52_v52 }
   0x8   :  { %v37_v2 = vsel %vm36_vm0, %v35_v1, 0.0  ;;  %73 = vmatpush.bf16.msra.mxu0 %v64_v4  ;;  %v444_v22 = vld [vmem:[#allocation2 + $0x8] sm:$0xff]  ;;  %v443_v23 = vld [vmem:[#allocation2] sm:$0xff]  ;;  %v458_v24 = vld [vmem:[#allocation2 + $0x78] sm:$0xff] }
   0x9   :  { %38 = vadd.xlane.f32.xlu0 %v37_v2  ;;  %229 = vmatpush.bf16.msra.mxu2 %v458_v24  ;;  %v457_v25 = vld [vmem:[#allocation2 + $0x70] sm:$0xff]  ;;  %v456_v26 = vld [vmem:[#allocation2 + $0x68] sm:$0xff]  ;;  %v455_v27 = vld [vmem:[#allocation2 + $0x60] sm:$0xff]  ;;  %vm54_vm5 = vcmp.lt.s32.totalorder %v53_v53, 2 }
   0xa   :  { %148 = vmatpush.bf16.msra.mxu1 %v449_v6  ;;  %v454_v28 = vld [vmem:[#allocation2 + $0x58] sm:$0xff]  ;;  %v453_v29 = vld [vmem:[#allocation2 + $0x50] sm:$0xff]  ;;  %v470_v30 = vld [vmem:[%s569_s3] ss:$0 sm:$0xff] }
   0xb   :  { %v452_v36 = vld [vmem:[#allocation2 + $0x48] sm:$0xff]  ;;  %v451_v37 = vld [vmem:[#allocation2 + $0x40] sm:$0xff]  ;;  %v466_v38 = vld [vmem:[#allocation2 + $0xb8] sm:$0xff] }
   0xc   :  { %325 = vmatpush.bf16.msra.mxu3 %v466_v38  ;;  %v465_v39 = vld [vmem:[#allocation2 + $0xb0] sm:$0xff]  ;;  %v464_v40 = vld [vmem:[#allocation2 + $0xa8] sm:$0xff]  ;;  %v463_v41 = vld [vmem:[#allocation2 + $0xa0] sm:$0xff] }
   0xd   :  { %230 = vmatpush.bf16.msra.mxu2 %v457_v25  ;;  %v462_v42 = vld [vmem:[#allocation2 + $0x98] sm:$0xff]  ;;  %v461_v43 = vld [vmem:[#allocation2 + $0x90] sm:$0xff]  ;;  %v471_v44 = vld [vmem:[%s569_s3 + $0x1] ss:$0 sm:$0xff] }
   0xe   :  { %149 = vmatpush.bf16.msra.mxu1 %v448_v7  ;;  %v460_v50 = vld [vmem:[#allocation2 + $0x88] sm:$0xff]  ;;  %v459_v51 = vld [vmem:[#allocation2 + $0x80] sm:$0xff] }
   0xf   :  { %v472_v54 = vld [vmem:[%s569_s3 + $0x2] ss:$0 sm:$0xff]  ;;  %v473_v4 = vld [vmem:[%s569_s3 + $0x3] ss:$0 sm:$0xff] }
  0x10   :  { %326 = vmatpush.bf16.msra.mxu3 %v465_v39 }
  0x11   :  { %231 = vmatpush.bf16.msra.mxu2 %v456_v26 }
  0x12   :  { %150 = vmatpush.bf16.msra.mxu1 %v447_v10 }
  0x14   :  { %327 = vmatpush.bf16.msra.mxu3 %v464_v40 }
  0x15   :  { %232 = vmatpush.bf16.msra.mxu2 %v455_v27 }
  0x16   :  { %151 = vmatpush.bf16.msra.mxu1 %v446_v11 }
  0x18   :  { %328 = vmatpush.bf16.msra.mxu3 %v463_v41 }
  0x19   :  { %233 = vmatpush.bf16.msra.mxu2 %v454_v28 }
  0x1a   :  { %152 = vmatpush.bf16.msra.mxu1 %v445_v14 }
  0x1c   :  { %329 = vmatpush.bf16.msra.mxu3 %v462_v42 }
  0x1d   :  { %234 = vmatpush.bf16.msra.mxu2 %v453_v29 }
  0x1e   :  { %153 = vmatpush.bf16.msra.mxu1 %v444_v22 }
  0x20   :  { %330 = vmatpush.bf16.msra.mxu3 %v461_v43 }
  0x21   :  { %235 = vmatpush.bf16.msra.mxu2 %v452_v36 }
  0x22   :  { %154 = vmatpush.bf16.msra.mxu1 %v443_v23 }
  0x24   :  { %331 = vmatpush.bf16.msra.mxu3 %v460_v50 }
  0x25   :  { %236 = vmatpush.bf16.msra.mxu2 %v451_v37 }
  0x28   :  { %332 = vmatpush.bf16.msra.mxu3 %v459_v51 }
  0x7c   :  { %v39_v8 = vpop.xlane.xlu0 %38 }
  0x7d   :  { %v40_v9 = vmax.f32 %v39_v8, 1e-24 }
  0x7f   :  { %474 = vrsqrt.f32 %v40_v9  ;;  %vm47_vm3 = vweird.f32 %v40_v9 }
  0x85   :  { %v475_v12 = vpop.eup %474 }
  0x86   :  { %v42_v13 = vmul.f32 %v475_v12, %v40_v9  ;;  %vm48_vm2 = vweird.f32 %v475_v12 }
  0x87   :  { %vm49_vm4 = vmor %vm47_vm3, %vm48_vm2 }
  0x88   :  { %v43_v15 = vmul.f32 %v475_v12, %v42_v13 }
  0x8a   :  { %v44_v16 = vmul.f32 0.5, %v43_v15 }
  0x8c   :  { %v45_v17 = vsub.f32 1.5, %v44_v16 }
  0x8e   :  { %v46_v18 = vmul.f32 %v475_v12, %v45_v17 }
  0x90   :  { %v50_v19 = vsel %vm49_vm4, %v475_v12, %v46_v18 }
  0x91   :  { %v51_v20 = vmul.f32 %v50_v19, %v34_v0 }
  0x93   :  { %v55_v21 = vpack.c.bf16 %v51_v20, %v51_v20 }
  0x95   :  { %346 = vmatmul.msk.bf16.vlgmr.msra.gmra.mxu0 %vm36_vm0, %v55_v21 }
 0x112   :  { %v75_v31 = vpop.f32.mrf.mxu0 }
 0x113   :  { %v76_v32 = vadd.f32 %v470_v30, %v75_v31 }
 0x115   :  { %v79_v33 = vmax.f32 %v76_v32, 0.0 }
 0x117   :  { %v80_v34 = vpack.c.bf16 %v79_v33, %v79_v33 }
 0x119   :  { %155 = vmatmul.bf16.vlgmr.msra.gmra.mxu1 %v80_v34 }
 0x11a   :  { %v77_v35 = vpop.f32.mrf.mxu0 }
 0x196   :  { %v156_v45 = vpop.f32.mrf.mxu1 }
 0x197   :  { %v157_v46 = vadd.f32 %v471_v44, %v156_v45 }
 0x199   :  { %v160_v47 = vmax.f32 %v157_v46, 0.0 }
 0x19b   :  { %v161_v48 = vpack.c.bf16 %v160_v47, %v160_v47 }
 0x19d   :  { %237 = vmatmul.bf16.vlgmr.msra.gmra.mxu2 %v161_v48 }
 0x19e   :  { %v158_v49 = vpop.f32.mrf.mxu1 }
 0x220   :  { %v238_v55 = vpop.f32.mrf.mxu2 }
 0x221   :  { %v239_v56 = vadd.f32 %v472_v54, %v238_v55 }
 0x223   :  { %v244_v57 = vsel %vm54_vm5, %v239_v56, -inf  ;;  %v256_v58 = vmax.f32 %v239_v56, 0.0 }
 0x224   :  { %245 = vmax.xlane.f32.xlu0 %v244_v57 }
 0x225   :  { %v257_v59 = vpack.c.bf16 %v256_v58, %v256_v58 }
 0x227   :  { %333 = vmatmul.bf16.vlgmr.msra.gmra.mxu3 %v257_v59 }
 0x228   :  { %v240_v60 = vpop.f32.mrf.mxu2 }
 0x297   :  { %v246_v61 = vpop.xlane.xlu0 %245 }
 0x298   :  { %v247_v62 = vsub.f32 %v239_v56, %v246_v61 }
 0x29a   :  { %v248_v63 = vmul.f32 1.442695, %v247_v62 }
 0x29c   :  { %476 = vpow2.f32 %v248_v63 }
 0x2a2   :  { %v477_v0 = vpop.eup %476 }
 0x2a3   :  { %v250_v1 = vsel %vm54_vm5, %v477_v0, 0.0 }
 0x2a4   :  { %251 = vadd.xlane.f32.xlu1 %v250_v1 }
 0x2aa   :  { %v334_v2 = vpop.f32.mrf.mxu3 }
 0x2ab   :  { %v335_v6 = vadd.f32 %v473_v4, %v334_v2 }
 0x2b2   :  { %v336_v3 = vpop.f32.mrf.mxu3 }
 0x317   :  { %v252_v5 = vpop.xlane.xlu1 %251 }
 0x318   :  { %478 = vlog2.f32 %v252_v5 }
 0x319   :  { %480 = vtanh.f32 %v335_v6 }
 0x31e   :  { %v479_v7 = vpop.eup %478 }
 0x31f   :  { %v254_v8 = vmul.f32 0.6931472, %v479_v7  ;;  %v481_v10 = vpop.eup %480 }
 0x321   :  { %v255_v9 = vsub.f32 %v247_v62, %v254_v8 }
 0x323   :  { %v339_v11 = vsel %vm54_vm5, %v255_v9, %v481_v10 }
 0x324   :  { %340 = vst.msk [vmem:[%s570_s4] sm:$0xff] %vm36_vm0, %v339_v11 }
 0x325   :  { %345 = vsyncpa [#allocation3], 1 }

</bundles_post_ra>
